<compile_context>
chip_gen: v6e
topology: v6e:2x2x1
jax: 0.10.0
libtpu: 0.0.40
codegen_flags: <defaults>
</compile_context>

<pallas_src>
import jax
import jax.numpy as jnp
from jax.experimental import pallas as pl
from jax.experimental.pallas import tpu as pltpu

N_EMBED = 768          # bert-base hidden size (typological=False -> no typ concat)
N_IN = N_EMBED * 2     # 1536, model_type='concat'
HIDDEN = 200           # mlp_hidden_size
HIDDEN_PAD = 256       # lane-aligned padded hidden (zero-padded weight columns)
N_RELS = 3             # entailment / neutral / contradiction
OUT_PAD = 128          # lane-dense output slab; wrapper slices [:, :N_RELS]


def enmlp_kernel(s1_ref, s2_ref, w1_ref, b1_ref, w2_ref, b2_ref, o_ref):
    # h = relu(concat(s1, s2) @ W1 + b1) computed as two accumulating K=768 dots
    # against static (tile-aligned, free) slices of the resident W1.
    # bf16 MXU operands, f32 accumulation.
    # TODO(synk): dropout(p=0.33) is identity in eval mode; training-mode masking omitted.
    s1 = s1_ref[...].astype(jnp.bfloat16)
    s2 = s2_ref[...].astype(jnp.bfloat16)
    h = jnp.dot(s1, w1_ref[:N_EMBED, :], preferred_element_type=jnp.float32)
    h = h + jnp.dot(s2, w1_ref[N_EMBED:, :], preferred_element_type=jnp.float32)
    h = jnp.maximum(h + b1_ref[...], 0.0)
    o = jnp.dot(h.astype(jnp.bfloat16), w2_ref[...],
                preferred_element_type=jnp.float32)
    o_ref[...] = (o + b2_ref[...]).astype(o_ref.dtype)


def _round_up(x, m):
    return ((x + m - 1) // m) * m


def prepare_params(w1, b1, w2, b2):
    """One-time weight prep (run at model init, NOT per forward call).

    Weights are [in_features, out_features] so the kernel computes x @ W + b
    (numerically identical to torch's Linear: x @ W.T + b with W of shape [out, in]).
    Zero-padding is numerically safe: zero W1/b1 columns -> relu(0)=0, zero W2
    rows/columns and zero b2 pad -> padded output columns are exactly 0.
    """
    w1p = (jnp.zeros((N_IN, HIDDEN_PAD), jnp.bfloat16)
           .at[:, :HIDDEN].set(w1.astype(jnp.bfloat16)))
    b1p = (jnp.zeros((1, HIDDEN_PAD), jnp.float32)
           .at[:, :HIDDEN].set(b1.astype(jnp.float32)))
    w2p = (jnp.zeros((HIDDEN_PAD, OUT_PAD), jnp.bfloat16)
           .at[:HIDDEN, :N_RELS].set(w2.astype(jnp.bfloat16)))
    b2p = (jnp.zeros((1, OUT_PAD), jnp.float32)
           .at[:, :N_RELS].set(b2.astype(jnp.float32)))
    return w1p, b1p, w2p, b2p


def _choose_tile(B):
    if B >= 256:
        # >=2 grid steps so the "parallel" batch axis shards over v7x's two
        # TensorCores; cap at 512 rows so per-step DMA (~3 MB) dwarfs the
        # ~0.35us step overhead while double-buffered f32 inputs + resident
        # weights stay ~8 MB, well under v5e's 16 MiB default scoped VMEM.
        return min(512, _round_up(pl.cdiv(B, 2), 16))
    # Round to 16 (bf16 native sublane tile) so the bf16 output block is aligned.
    return _round_up(max(B, 1), 16)


def enmlp_forward(sent1_embed, sent2_embed, params):
    """sent*_embed: [B, 768] f32; params: output of prepare_params()."""
    w1p, b1p, w2p, b2p = params
    B = sent1_embed.shape[0]

    tm = _choose_tile(B)
    Bp = _round_up(B, tm)
    if Bp != B:
        pad = ((0, Bp - B), (0, 0))
        sent1_embed = jnp.pad(sent1_embed, pad)
        sent2_embed = jnp.pad(sent2_embed, pad)
    grid = (Bp // tm,)

    cost = pl.CostEstimate(
        flops=2 * Bp * (N_IN * HIDDEN_PAD + HIDDEN_PAD * OUT_PAD),
        transcendentals=0,
        bytes_accessed=(2 * Bp * N_EMBED * 4          # two f32 embedding reads
                        + w1p.size * 2 + w2p.size * 2  # bf16 weights
                        + b1p.size * 4 + b2p.size * 4  # f32 biases
                        + Bp * OUT_PAD * 2),           # bf16 output writeback
    )

    out = pl.pallas_call(
        enmlp_kernel,
        out_shape=jax.ShapeDtypeStruct((Bp, OUT_PAD), jnp.bfloat16),
        grid=grid,
        in_specs=[
            pl.BlockSpec((tm, N_EMBED), lambda i: (i, 0)),          # sent1: tiled over B
            pl.BlockSpec((tm, N_EMBED), lambda i: (i, 0)),          # sent2: tiled over B
            pl.BlockSpec((N_IN, HIDDEN_PAD), lambda i: (0, 0)),     # W1 resident
            pl.BlockSpec((1, HIDDEN_PAD), lambda i: (0, 0)),        # b1 resident
            pl.BlockSpec((HIDDEN_PAD, OUT_PAD), lambda i: (0, 0)),  # W2 resident
            pl.BlockSpec((1, OUT_PAD), lambda i: (0, 0)),           # b2 resident
        ],
        out_specs=pl.BlockSpec((tm, OUT_PAD), lambda i: (i, 0)),
        compiler_params=pltpu.CompilerParams(dimension_semantics=("parallel",)),
        cost_estimate=cost,
    )(sent1_embed, sent2_embed, w1p, b1p, w2p, b2p)

    return out[:B, :N_RELS].astype(jnp.float32)


def reference_forward(sent1_embed, sent2_embed, w1, b1, w2, b2):
    x = jnp.concatenate([sent1_embed, sent2_embed], axis=-1)
    h = jnp.maximum(x @ w1 + b1, 0.0)
    return h @ w2 + b2


if __name__ == "__main__":
    key = jax.random.PRNGKey(0)
    k_s1, k_w1, k_b1, k_w2, k_b2 = jax.random.split(key, 5)

    # Stand-in for LMEmbedding(sent1) CLS output: shape [1, 768] (squeeze(0) -> [768]).
    # TODO(synk): LMEmbedding (BERT encoder) not implemented as a Pallas kernel.
    sent1_embed = jax.random.normal(k_s1, (1, N_EMBED), dtype=jnp.float32)
    # Original forward encodes sent1 for BOTH embeddings (as written in the module).
    sent2_embed = sent1_embed

    # Deterministic MLP parameter init (shapes from MLP(n_in=1536, hidden=200, n_out=3)).
    w1 = jax.random.normal(k_w1, (N_IN, HIDDEN), dtype=jnp.float32) * 0.02
    b1 = jax.random.normal(k_b1, (HIDDEN,), dtype=jnp.float32) * 0.02
    w2 = jax.random.normal(k_w2, (HIDDEN, N_RELS), dtype=jnp.float32) * 0.02
    b2 = jax.random.normal(k_b2, (N_RELS,), dtype=jnp.float32) * 0.02

    # Weight prep happens ONCE (model init), not per forward call.
    params = prepare_params(w1, b1, w2, b2)

    logits = enmlp_forward(sent1_embed, sent2_embed, params)
    logits = jax.block_until_ready(logits)

    ref = reference_forward(sent1_embed, sent2_embed, w1, b1, w2, b2)
    assert logits.shape == (1, N_RELS), logits.shape
    # bf16 MXU operands / bf16 output store with f32 accumulation -> compare against
    # the f32 reference with tolerance comfortably above the ~1e-3 quantization error.
    assert jnp.allclose(logits, ref, atol=2e-2, rtol=2e-2), (logits, ref)

    # Match torch semantics after squeeze(0): a 1-D logits vector of size n_rels.
    _ = logits.reshape(N_RELS)
    print("KERNEL_OK")
</pallas_src>

<mosaic_0001>
module attributes {stable_mosaic.version = 11 : i64} {
  func.func @enmlp_kernel(%arg0: i32, %arg1: memref<16x768xf32, #tpu.memory_space<vmem>>, %arg2: memref<16x768xf32, #tpu.memory_space<vmem>>, %arg3: memref<1536x256xbf16, #tpu.memory_space<vmem>>, %arg4: memref<1x256xf32, #tpu.memory_space<vmem>>, %arg5: memref<256x128xbf16, #tpu.memory_space<vmem>>, %arg6: memref<1x128xf32, #tpu.memory_space<vmem>>, %arg7: memref<16x128xbf16, #tpu.memory_space<vmem>>) attributes {dimension_semantics = [#tpu.dimension_semantics<parallel>], iteration_bounds = array<i64: 1>, scalar_prefetch = 0 : i64, scratch_operands = 0 : i64, tpu.core_type = #tpu.core_type<tc>, window_params = [{transform_indices = @transform_0, window_bounds = array<i64: 16, 768>}, {transform_indices = @transform_1, window_bounds = array<i64: 16, 768>}, {pipeline_mode = #tpu.pipeline_mode<synchronous>, transform_indices = @transform_2, window_bounds = array<i64: 1536, 256>}, {pipeline_mode = #tpu.pipeline_mode<synchronous>, transform_indices = @transform_3, window_bounds = array<i64: 1, 256>}, {pipeline_mode = #tpu.pipeline_mode<synchronous>, transform_indices = @transform_4, window_bounds = array<i64: 256, 128>}, {pipeline_mode = #tpu.pipeline_mode<synchronous>, transform_indices = @transform_5, window_bounds = array<i64: 1, 128>}, {transform_indices = @transform_6, window_bounds = array<i64: 16, 128>}]} {
    %c0 = arith.constant 0 : index
    %c0_0 = arith.constant 0 : index
    %0 = vector.load %arg1[%c0, %c0_0] : memref<16x768xf32, #tpu.memory_space<vmem>>, vector<16x768xf32>
    %1 = arith.truncf %0 : vector<16x768xf32> to vector<16x768xbf16>
    %c0_1 = arith.constant 0 : index
    %c0_2 = arith.constant 0 : index
    %2 = vector.load %arg2[%c0_1, %c0_2] : memref<16x768xf32, #tpu.memory_space<vmem>>, vector<16x768xf32>
    %3 = arith.truncf %2 : vector<16x768xf32> to vector<16x768xbf16>
    %c0_3 = arith.constant 0 : index
    %c0_4 = arith.constant 0 : index
    %4 = vector.load %arg3[%c0_3, %c0_4] : memref<1536x256xbf16, #tpu.memory_space<vmem>>, vector<768x256xbf16>
    %cst = arith.constant dense<0.000000e+00> : vector<16x256xf32>
    %5 = tpu.matmul %1, %4, %cst {dimension_numbers = #tpu.dot_dimension_numbers<[1], [0], [0], [1], [0, 0, 1, 1], [], []>} : vector<16x768xbf16>, vector<768x256xbf16>, vector<16x256xf32> -> vector<16x256xf32>
    %c768 = arith.constant 768 : index
    %c0_5 = arith.constant 0 : index
    %6 = vector.load %arg3[%c768, %c0_5] : memref<1536x256xbf16, #tpu.memory_space<vmem>>, vector<768x256xbf16>
    %cst_6 = arith.constant dense<0.000000e+00> : vector<16x256xf32>
    %7 = tpu.matmul %3, %6, %cst_6 {dimension_numbers = #tpu.dot_dimension_numbers<[1], [0], [0], [1], [0, 0, 1, 1], [], []>} : vector<16x768xbf16>, vector<768x256xbf16>, vector<16x256xf32> -> vector<16x256xf32>
    %8 = arith.addf %5, %7 : vector<16x256xf32>
    %c0_7 = arith.constant 0 : index
    %c0_8 = arith.constant 0 : index
    %9 = vector.load %arg4[%c0_7, %c0_8] : memref<1x256xf32, #tpu.memory_space<vmem>>, vector<1x256xf32>
    %10 = vector.broadcast %9 : vector<1x256xf32> to vector<16x256xf32>
    %11 = arith.addf %8, %10 : vector<16x256xf32>
    %cst_9 = arith.constant 0.000000e+00 : f32
    %12 = vector.broadcast %cst_9 : f32 to vector<16x256xf32>
    %13 = arith.maximumf %11, %12 : vector<16x256xf32>
    %14 = arith.truncf %13 : vector<16x256xf32> to vector<16x256xbf16>
    %c0_10 = arith.constant 0 : index
    %c0_11 = arith.constant 0 : index
    %15 = vector.load %arg5[%c0_10, %c0_11] : memref<256x128xbf16, #tpu.memory_space<vmem>>, vector<256x128xbf16>
    %cst_12 = arith.constant dense<0.000000e+00> : vector<16x128xf32>
    %16 = tpu.matmul %14, %15, %cst_12 {dimension_numbers = #tpu.dot_dimension_numbers<[1], [0], [0], [1], [0, 0, 1, 1], [], []>} : vector<16x256xbf16>, vector<256x128xbf16>, vector<16x128xf32> -> vector<16x128xf32>
    %c0_13 = arith.constant 0 : index
    %c0_14 = arith.constant 0 : index
    %17 = vector.load %arg6[%c0_13, %c0_14] : memref<1x128xf32, #tpu.memory_space<vmem>>, vector<1x128xf32>
    %18 = vector.broadcast %17 : vector<1x128xf32> to vector<16x128xf32>
    %19 = arith.addf %16, %18 : vector<16x128xf32>
    %20 = arith.truncf %19 : vector<16x128xf32> to vector<16x128xbf16>
    %c0_15 = arith.constant 0 : index
    %c0_16 = arith.constant 0 : index
    %21 = vector.load %arg7[%c0_15, %c0_16] : memref<16x128xbf16, #tpu.memory_space<vmem>>, vector<16x128xbf16>
    tpu.vector_store %arg7[%c0_15, %c0_16], %20 {strides = array<i32>} : memref<16x128xbf16, #tpu.memory_space<vmem>>, vector<16x128xbf16>,
    return
  }
  func.func @transform_0(%arg0: i32) -> (i32, i32) {
    %c0_i32 = arith.constant 0 : i32
    %c0_i32_0 = arith.constant 0 : i32
    return %arg0, %c0_i32 : i32, i32
  }
  func.func @transform_1(%arg0: i32) -> (i32, i32) {
    %c0_i32 = arith.constant 0 : i32
    %c0_i32_0 = arith.constant 0 : i32
    return %arg0, %c0_i32 : i32, i32
  }
  func.func @transform_2(%arg0: i32) -> (i32, i32) {
    %c0_i32 = arith.constant 0 : i32
    %c0_i32_0 = arith.constant 0 : i32
    %c0_i32_1 = arith.constant 0 : i32
    return %c0_i32, %c0_i32_0 : i32, i32
  }
  func.func @transform_3(%arg0: i32) -> (i32, i32) {
    %c0_i32 = arith.constant 0 : i32
    %c0_i32_0 = arith.constant 0 : i32
    %c0_i32_1 = arith.constant 0 : i32
    return %c0_i32, %c0_i32_0 : i32, i32
  }
  func.func @transform_4(%arg0: i32) -> (i32, i32) {
    %c0_i32 = arith.constant 0 : i32
    %c0_i32_0 = arith.constant 0 : i32
    %c0_i32_1 = arith.constant 0 : i32
    return %c0_i32, %c0_i32_0 : i32, i32
  }
  func.func @transform_5(%arg0: i32) -> (i32, i32) {
    %c0_i32 = arith.constant 0 : i32
    %c0_i32_0 = arith.constant 0 : i32
    %c0_i32_1 = arith.constant 0 : i32
    return %c0_i32, %c0_i32_0 : i32, i32
  }
  func.func @transform_6(%arg0: i32) -> (i32, i32) {
    %c0_i32 = arith.constant 0 : i32
    %c0_i32_0 = arith.constant 0 : i32
    return %arg0, %c0_i32 : i32, i32
  }
}

</mosaic_0001>

<bundles_post_ra>
// kernel: tpu_custom_call.1
= control target key start
LH: loop header
LB: loop body
LE: loop exit
PB: predicated region body
PF: predicated region fallthrough
CT: control target
= control target key end

     0   :  { %11 = vsyncpa [#allocation3], 0  ;;  %s2489_s0 = inlined_call_operand.hbm [shape: f32[16,768], index: 0, kind: input, shape index: {}]   ;;  %s2490_s1 = inlined_call_operand.hbm [shape: f32[16,768], index: 1, kind: input, shape index: {}]   ;;  %s2491_s2 = inlined_call_operand.hbm [shape: bf16[1536,256], index: 2, kind: input, shape index: {}]   ;;  %s2492_s3 = inlined_call_operand.vmem [shape: f32[1,256], index: 3, kind: input, shape index: {}]   ;;  %s2493_s4 = inlined_call_operand.hbm [shape: bf16[256,128], index: 4, kind: input, shape index: {}]   ;;  %s2494_s5 = inlined_call_operand.vmem [shape: f32[1,128], index: 5, kind: input, shape index: {}]   ;;  %s2495_s6 = inlined_call_operand.hbm [shape: bf16[16,128], index: 6, kind: output, shape index: {}]  }
   0x1   :  { %12 = vsyncpa [#allocation6], 0 }
   0x2   :  { %13 = vsyncpa [#allocation9], 0 }
   0x3   :  { %14 = vsyncpa [#allocation4], 0  ;;  %s2416_s21 = smov [#allocation5]   ;;  %s2417_s23 = smov [#allocation2]  }
   0x4   :  { %s32_s22 = sshll.u32 %s2416_s21, 4  ;;  %s20_s24 = sshll.u32 %s2417_s23, 4  ;;  %s33_s22 = int_to_ptr.vmem [resolvable:$true] %s32_s22  ;;  %s21_s24 = int_to_ptr.vmem [resolvable:$true] %s20_s24 }
   0x5   :  { %s2316_s25 = scalar_lea.vmem %s33_s22, 1536  ;;  %p2321_p1 = scmp.lt.s32.totalorder %s33_s22, %s33_s22 }
   0x6   :  { %p2317_p0 = scmp.ne.s32.totalorder %s33_s22, %s2316_s25  ;;  %p2322_p2 = scmp.lt.s32.totalorder %s2316_s25, %s2316_s25 }
   0x8   :  { %p2323_p3 = por %p2322_p2, %p2321_p1 }
   0xa   :  { %p2324_p4 = pnand %p2323_p3, %p2317_p0 }
   0xc   :  { %2327 = shalt.err (!%p2324_p4)
}
   0xd   :  { %s2418_s26 = smov 768   ;;  %s2419_s27 = smov 48  }
   0xe   :  { %38 = dma.hbm_to_vmem [thread:$0]  %s2490_s1, 1536, %s33_s22, [#allocation6], %s2418_s26, %s2418_s26, %s2419_s27  }
   0xf   :  { %s2336_s30 = scalar_lea.vmem %s21_s24, 1536  ;;  %p2341_p6 = scmp.lt.s32.totalorder %s21_s24, %s21_s24 }
  0x10   :  { %p2337_p5 = scmp.ne.s32.totalorder %s21_s24, %s2336_s30  ;;  %p2342_p7 = scmp.lt.s32.totalorder %s2336_s30, %s2336_s30 }
  0x12   :  { %p2343_p8 = por %p2342_p7, %p2341_p6 }
  0x14   :  { %p2344_p9 = pnand %p2343_p8, %p2337_p5 }
  0x16   :  { %2347 = shalt.err (!%p2344_p9)
}
  0x17   :  { %26 = dma.hbm_to_vmem [thread:$0]  %s2489_s0, 1536, %s21_s24, [#allocation3], %s2418_s26, %s2418_s26, %s2419_s27  }
  0x18   :  { %s2420_s9 = smov [#allocation7]  }
  0x19   :  { %s44_s10 = sshll.u32 %s2420_s9, 4  ;;  %s45_s10 = int_to_ptr.vmem [resolvable:$true] %s44_s10 }
  0x1a   :  { %s2356_s11 = scalar_lea.vmem %s45_s10, 24576  ;;  %p2361_p11 = scmp.lt.s32.totalorder %s45_s10, %s45_s10 }
  0x1b   :  { %p2357_p10 = scmp.ne.s32.totalorder %s45_s10, %s2356_s11  ;;  %p2362_p12 = scmp.lt.s32.totalorder %s2356_s11, %s2356_s11 }
  0x1d   :  { %p2363_p13 = por %p2362_p12, %p2361_p11 }
  0x1f   :  { %p2364_p0 = pnand %p2363_p13, %p2357_p10 }
  0x21   :  { %2367 = shalt.err (!%p2364_p0)
}
  0x22   :  { %s2421_s1 = smov 128   ;;  %s2422_s12 = smov 8  }
  0x23   :  { %50 = dma.hbm_to_vmem [thread:$0]  %s2491_s2, 24576, %s45_s10, [#allocation6], %s2421_s1, %s2421_s1, %s2422_s12  }
  0x24   :  { %s2423_s15 = smov [#allocation8]  }
  0x25   :  { %s58_s16 = sshll.u32 %s2423_s15, 4  ;;  %s59_s16 = int_to_ptr.vmem [resolvable:$true] %s58_s16 }
  0x26   :  { %s2376_s0 = scalar_lea.vmem %s59_s16, 2048  ;;  %p2381_p2 = scmp.lt.s32.totalorder %s59_s16, %s59_s16 }
  0x27   :  { %p2377_p1 = scmp.ne.s32.totalorder %s59_s16, %s2376_s0  ;;  %p2382_p3 = scmp.lt.s32.totalorder %s2376_s0, %s2376_s0 }
  0x29   :  { %p2383_p4 = por %p2382_p3, %p2381_p2 }
  0x2b   :  { %p2384_p5 = pnand %p2383_p4, %p2377_p1 }
  0x2d   :  { %2387 = shalt.err (!%p2384_p5)
}
  0x2e   :  { %s2424_s17 = smov 64   ;;  %s2425_s18 = smov 4  }
  0x2f   :  { %64 = dma.hbm_to_vmem [thread:$0]  %s2493_s4, 2048, %s59_s16, [#allocation9], %s2424_s17, %s2424_s17, %s2425_s18  }
  0x30   :  { %2408 = dma.done.wait [#allocation3], 1536  }
  0x31   :  { %2409 = vsyncadd [#allocation3], 4294965760 }
  0x32   :  { %2410 = dma.done.wait [#allocation6], 26112  }
  0x33   :  { %2411 = vsyncadd [#allocation6], 4294941184 }
  0x34   :  { %2412 = dma.done.wait [#allocation9], 2048  }
  0x35   :  { %2413 = vsyncadd [#allocation9], 4294965248  ;;  %v2004_v0 = vld [vmem:[#allocation7 + $0x374] ss:$8 sps:$4 sm:$0xff]   ;;  %v2008_v2 = vld [vmem:[#allocation7 + $0x370] ss:$8 sps:$4 sm:$0xff]  }
  0x36   :  { %v2006_v1 = vld [vmem:[#allocation7 + $0x474] ss:$8 sps:$4 sm:$0xff]   ;;  %788 = vmatprep.subr.bf16.mxu0 %v2004_v0  ;;  %v2009_v3 = vld [vmem:[#allocation7 + $0x470] ss:$8 sps:$4 sm:$0xff]   ;;  %v2010_v4 = vld [vmem:[#allocation7 + $0x364] ss:$8 sps:$4 sm:$0xff]  }
  0x37   :  { %831 = vmatprep.subr.bf16.mxu1 %v2006_v1  ;;  %789 = vmatpush1.bf16.msra.mxu0 %v2008_v2  ;;  %v2012_v5 = vld [vmem:[#allocation7 + $0x464] ss:$8 sps:$4 sm:$0xff]   ;;  %v2014_v6 = vld [vmem:[#allocation7 + $0x360] ss:$8 sps:$4 sm:$0xff]   ;;  %v2016_v8 = vld [vmem:[#allocation7 + $0x354] ss:$8 sps:$4 sm:$0xff]  }
  0x38   :  { %832 = vmatpush1.bf16.msra.mxu1 %v2009_v3  ;;  %790 = vmatprep.subr.bf16.mxu0 %v2010_v4  ;;  %v2015_v7 = vld [vmem:[#allocation7 + $0x460] ss:$8 sps:$4 sm:$0xff]   ;;  %v2018_v9 = vld [vmem:[#allocation7 + $0x454] ss:$8 sps:$4 sm:$0xff]   ;;  %v2020_v10 = vld [vmem:[#allocation7 + $0x350] ss:$8 sps:$4 sm:$0xff]  }
  0x39   :  { %833 = vmatprep.subr.bf16.mxu1 %v2012_v5  ;;  %v2021_v11 = vld [vmem:[#allocation7 + $0x450] ss:$8 sps:$4 sm:$0xff]   ;;  %v2022_v12 = vld [vmem:[#allocation7 + $0x344] ss:$8 sps:$4 sm:$0xff]   ;;  %v2026_v14 = vld [vmem:[#allocation7 + $0x340] ss:$8 sps:$4 sm:$0xff]  }
  0x3a   :  { %v2024_v13 = vld [vmem:[#allocation7 + $0x444] ss:$8 sps:$4 sm:$0xff]   ;;  %v2027_v15 = vld [vmem:[#allocation7 + $0x440] ss:$8 sps:$4 sm:$0xff]   ;;  %v2028_v16 = vld [vmem:[#allocation7 + $0x334] ss:$8 sps:$4 sm:$0xff]  }
  0x3b   :  { %791 = vmatpush1.bf16.msra.mxu0 %v2014_v6  ;;  %v2030_v17 = vld [vmem:[#allocation7 + $0x434] ss:$8 sps:$4 sm:$0xff]   ;;  %v2032_v18 = vld [vmem:[#allocation7 + $0x330] ss:$8 sps:$4 sm:$0xff]   ;;  %v2034_v20 = vld [vmem:[#allocation7 + $0x324] ss:$8 sps:$4 sm:$0xff]  }
  0x3c   :  { %834 = vmatpush1.bf16.msra.mxu1 %v2015_v7  ;;  %792 = vmatprep.subr.bf16.mxu0 %v2016_v8  ;;  %v2033_v19 = vld [vmem:[#allocation7 + $0x430] ss:$8 sps:$4 sm:$0xff]   ;;  %v2036_v21 = vld [vmem:[#allocation7 + $0x424] ss:$8 sps:$4 sm:$0xff]   ;;  %v2038_v22 = vld [vmem:[#allocation7 + $0x320] ss:$8 sps:$4 sm:$0xff]  }
  0x3d   :  { %835 = vmatprep.subr.bf16.mxu1 %v2018_v9  ;;  %v2039_v23 = vld [vmem:[#allocation7 + $0x420] ss:$8 sps:$4 sm:$0xff]   ;;  %v2040_v24 = vld [vmem:[#allocation7 + $0x314] ss:$8 sps:$4 sm:$0xff]   ;;  %v2044_v26 = vld [vmem:[#allocation7 + $0x310] ss:$8 sps:$4 sm:$0xff]  }
  0x3e   :  { %v2042_v25 = vld [vmem:[#allocation7 + $0x414] ss:$8 sps:$4 sm:$0xff]   ;;  %v2045_v27 = vld [vmem:[#allocation7 + $0x410] ss:$8 sps:$4 sm:$0xff]   ;;  %v2046_v28 = vld [vmem:[#allocation7 + $0x304] ss:$8 sps:$4 sm:$0xff]  }
  0x3f   :  { %793 = vmatpush1.bf16.msra.mxu0 %v2020_v10  ;;  %v2048_v29 = vld [vmem:[#allocation7 + $0x404] ss:$8 sps:$4 sm:$0xff]   ;;  %v2050_v30 = vld [vmem:[#allocation7 + $0x300] ss:$8 sps:$4 sm:$0xff]   ;;  %v2052_v32 = vld [vmem:[#allocation7 + $0x3f4] ss:$8 sps:$4 sm:$0xff]  }
  0x40   :  { %836 = vmatpush1.bf16.msra.mxu1 %v2021_v11  ;;  %794 = vmatprep.subr.bf16.mxu0 %v2022_v12  ;;  %v2051_v31 = vld [vmem:[#allocation7 + $0x400] ss:$8 sps:$4 sm:$0xff]   ;;  %v2054_v33 = vld [vmem:[#allocation7 + $0x4f4] ss:$8 sps:$4 sm:$0xff]   ;;  %v2056_v34 = vld [vmem:[#allocation7 + $0x3f0] ss:$8 sps:$4 sm:$0xff]  }
  0x41   :  { %837 = vmatprep.subr.bf16.mxu1 %v2024_v13  ;;  %v2057_v35 = vld [vmem:[#allocation7 + $0x4f0] ss:$8 sps:$4 sm:$0xff]   ;;  %v2058_v36 = vld [vmem:[#allocation7 + $0x3e4] ss:$8 sps:$4 sm:$0xff]   ;;  %v2062_v38 = vld [vmem:[#allocation7 + $0x3e0] ss:$8 sps:$4 sm:$0xff]  }
  0x42   :  { %v2060_v37 = vld [vmem:[#allocation7 + $0x4e4] ss:$8 sps:$4 sm:$0xff]   ;;  %v2063_v39 = vld [vmem:[#allocation7 + $0x4e0] ss:$8 sps:$4 sm:$0xff]   ;;  %v2064_v40 = vld [vmem:[#allocation7 + $0x3d4] ss:$8 sps:$4 sm:$0xff]  }
  0x43   :  { %795 = vmatpush1.bf16.msra.mxu0 %v2026_v14  ;;  %v2066_v41 = vld [vmem:[#allocation7 + $0x4d4] ss:$8 sps:$4 sm:$0xff]   ;;  %v2068_v42 = vld [vmem:[#allocation7 + $0x3d0] ss:$8 sps:$4 sm:$0xff]   ;;  %v2070_v44 = vld [vmem:[#allocation7 + $0x3c4] ss:$8 sps:$4 sm:$0xff]  }
  0x44   :  { %838 = vmatpush1.bf16.msra.mxu1 %v2027_v15  ;;  %796 = vmatprep.subr.bf16.mxu0 %v2028_v16  ;;  %v2069_v43 = vld [vmem:[#allocation7 + $0x4d0] ss:$8 sps:$4 sm:$0xff]   ;;  %v2072_v45 = vld [vmem:[#allocation7 + $0x4c4] ss:$8 sps:$4 sm:$0xff]   ;;  %v2074_v50 = vld [vmem:[#allocation7 + $0x3c0] ss:$8 sps:$4 sm:$0xff]  }
  0x45   :  { %839 = vmatprep.subr.bf16.mxu1 %v2030_v17  ;;  %v99_v46 = vld [vmem:[#allocation5 + $0x8] sm:$0xff]  ;;  %v105_v47 = vld [vmem:[#allocation5 + $0x38] sm:$0xff]  ;;  %v98_v6 = vld [vmem:[#allocation5] sm:$0xff]  ;;  %s2426_s22 = smov [#allocation10]  }
  0x46   :  { %v101_v48 = vld [vmem:[#allocation5 + $0x18] sm:$0xff]  ;;  %v107_v49 = vld [vmem:[#allocation5 + $0x48] sm:$0xff]  ;;  %v111_v53 = vpack.c.bf16 %v105_v47, %v99_v46  ;;  %v104_v7 = vld [vmem:[#allocation5 + $0x30] sm:$0xff]  ;;  %s1739_s23 = sshll.u32 %s2426_s22, 4  ;;  %s1740_s23 = int_to_ptr.vmem [resolvable:$true] %s1739_s23 }
  0x47   :  { %797 = vmatpush1.bf16.msra.mxu0 %v2032_v18  ;;  %v2075_v51 = vld [vmem:[#allocation7 + $0x4c0] ss:$8 sps:$4 sm:$0xff]   ;;  %v2076_v52 = vld [vmem:[#allocation7 + $0x3b4] ss:$8 sps:$4 sm:$0xff]   ;;  %v113_v54 = vpack.c.bf16 %v107_v49, %v101_v48  ;;  %v2080_v56 = vld [vmem:[#allocation7 + $0x3b0] ss:$8 sps:$4 sm:$0xff]   ;;  %v110_v12 = vpack.c.bf16 %v104_v7, %v98_v6  ;;  %p2393_p7 = scmp.lt.s32.totalorder %s1740_s23, %s1740_s23 }
  0x48   :  { %840 = vmatpush1.bf16.msra.mxu1 %v2033_v19  ;;  %798 = vmatprep.subr.bf16.mxu0 %v2034_v20  ;;  %v2078_v55 = vld [vmem:[#allocation7 + $0x4b4] ss:$8 sps:$4 sm:$0xff]   ;;  %v2081_v57 = vld [vmem:[#allocation7 + $0x4b0] ss:$8 sps:$4 sm:$0xff]   ;;  %v2082_v58 = vld [vmem:[#allocation7 + $0x3a4] ss:$8 sps:$4 sm:$0xff]  }
  0x49   :  { %841 = vmatprep.subr.bf16.mxu1 %v2036_v21  ;;  %820 = vmatprep.mubr.bf16.mxu0 %v111_v53  ;;  %v2084_v59 = vld [vmem:[#allocation7 + $0x4a4] ss:$8 sps:$4 sm:$0xff]   ;;  %v2086_v60 = vld [vmem:[#allocation7 + $0x3a0] ss:$8 sps:$4 sm:$0xff]   ;;  %v2088_v62 = vld [vmem:[#allocation7 + $0x394] ss:$8 sps:$4 sm:$0xff]  }
  0x4a   :  { %863 = vmatprep.mubr.bf16.mxu1 %v113_v54  ;;  %v2087_v61 = vld [vmem:[#allocation7 + $0x4a0] ss:$8 sps:$4 sm:$0xff]   ;;  %v2090_v63 = vld [vmem:[#allocation7 + $0x494] ss:$8 sps:$4 sm:$0xff]   ;;  %v2092_v0 = vld [vmem:[#allocation7 + $0x390] ss:$8 sps:$4 sm:$0xff]  }
  0x4b   :  { %799 = vmatpush1.bf16.msra.mxu0 %v2038_v22  ;;  %v2093_v1 = vld [vmem:[#allocation7 + $0x490] ss:$8 sps:$4 sm:$0xff]   ;;  %v2094_v2 = vld [vmem:[#allocation7 + $0x384] ss:$8 sps:$4 sm:$0xff]   ;;  %v2098_v4 = vld [vmem:[#allocation7 + $0x380] ss:$8 sps:$4 sm:$0xff]  }
  0x4c   :  { %842 = vmatpush1.bf16.msra.mxu1 %v2039_v23  ;;  %800 = vmatprep.subr.bf16.mxu0 %v2040_v24  ;;  %v2096_v3 = vld [vmem:[#allocation7 + $0x484] ss:$8 sps:$4 sm:$0xff]   ;;  %v2099_v5 = vld [vmem:[#allocation7 + $0x480] ss:$8 sps:$4 sm:$0xff]   ;;  %v100_v8 = vld [vmem:[#allocation5 + $0x10] sm:$0xff]  ;;  %s2388_s24 = scalar_lea.vmem %s1740_s23, 128 }
  0x4d   :  { %843 = vmatprep.subr.bf16.mxu1 %v2042_v25  ;;  %v106_v9 = vld [vmem:[#allocation5 + $0x40] sm:$0xff]  ;;  %v2102_v10 = vld [vmem:[#allocation7 + $0x574] ss:$8 sps:$4 sm:$0xff]   ;;  %v2100_v14 = vld [vmem:[#allocation7 + $0x570] ss:$8 sps:$4 sm:$0xff]   ;;  %p2389_p6 = scmp.ne.s32.totalorder %s1740_s23, %s2388_s24  ;;  %p2394_p8 = scmp.lt.s32.totalorder %s2388_s24, %s2388_s24 }
  0x4e   :  { %v2105_v11 = vld [vmem:[#allocation7 + $0x74] ss:$8 sps:$4 sm:$0xff]   ;;  %v112_v13 = vpack.c.bf16 %v106_v9, %v100_v8  ;;  %v2103_v15 = vld [vmem:[#allocation7 + $0x70] ss:$8 sps:$4 sm:$0xff]   ;;  %v2108_v16 = vld [vmem:[#allocation7 + $0x564] ss:$8 sps:$4 sm:$0xff]  }
  0x4f   :  { %801 = vmatpush1.bf16.msra.mxu0 %v2044_v26  ;;  %v2111_v17 = vld [vmem:[#allocation7 + $0x64] ss:$8 sps:$4 sm:$0xff]   ;;  %v2106_v18 = vld [vmem:[#allocation7 + $0x560] ss:$8 sps:$4 sm:$0xff]   ;;  %v2114_v20 = vld [vmem:[#allocation7 + $0x554] ss:$8 sps:$4 sm:$0xff]   ;;  %p2395_p9 = por %p2394_p8, %p2393_p7 }
  0x50   :  { %844 = vmatpush1.bf16.msra.mxu1 %v2045_v27  ;;  %802 = vmatprep.subr.bf16.mxu0 %v2046_v28  ;;  %v2109_v19 = vld [vmem:[#allocation7 + $0x60] ss:$8 sps:$4 sm:$0xff]   ;;  %v2117_v21 = vld [vmem:[#allocation7 + $0x54] ss:$8 sps:$4 sm:$0xff]   ;;  %v2112_v22 = vld [vmem:[#allocation7 + $0x550] ss:$8 sps:$4 sm:$0xff]  }
  0x51   :  { %845 = vmatprep.subr.bf16.mxu1 %v2048_v29  ;;  %v2115_v23 = vld [vmem:[#allocation7 + $0x50] ss:$8 sps:$4 sm:$0xff]   ;;  %v2120_v24 = vld [vmem:[#allocation7 + $0x544] ss:$8 sps:$4 sm:$0xff]   ;;  %v2118_v26 = vld [vmem:[#allocation7 + $0x540] ss:$8 sps:$4 sm:$0xff]   ;;  %p2396_p10 = pnand %p2395_p9, %p2389_p6 }
  0x52   :  { %v2123_v25 = vld [vmem:[#allocation7 + $0x44] ss:$8 sps:$4 sm:$0xff]   ;;  %v2121_v27 = vld [vmem:[#allocation7 + $0x40] ss:$8 sps:$4 sm:$0xff]   ;;  %v2126_v28 = vld [vmem:[#allocation7 + $0x534] ss:$8 sps:$4 sm:$0xff]  }
  0x53   :  { %803 = vmatpush1.bf16.msra.mxu0 %v2050_v30  ;;  %v2129_v29 = vld [vmem:[#allocation7 + $0x34] ss:$8 sps:$4 sm:$0xff]   ;;  %v2124_v30 = vld [vmem:[#allocation7 + $0x530] ss:$8 sps:$4 sm:$0xff]   ;;  %v2142_v48 = vld [vmem:[#allocation7 + $0x500] ss:$8 sps:$4 sm:$0xff]  }
  0x54   :  { %846 = vmatpush1.bf16.msra.mxu1 %v2051_v31  ;;  %804 = vmatprep.subr.bf16.mxu0 %v2052_v32  ;;  %v2127_v31 = vld [vmem:[#allocation7 + $0x30] ss:$8 sps:$4 sm:$0xff]   ;;  %v2132_v32 = vld [vmem:[#allocation7 + $0x524] ss:$8 sps:$4 sm:$0xff]   ;;  %v2145_v49 = vld [vmem:[#allocation7] ss:$8 sps:$4 sm:$0xff]  }
  0x55   :  { %847 = vmatprep.subr.bf16.mxu1 %v2054_v33  ;;  %v2135_v33 = vld [vmem:[#allocation7 + $0x24] ss:$8 sps:$4 sm:$0xff]   ;;  %v87_v46 = vld [vmem:[#allocation2 + $0x38] sm:$0xff]  ;;  %v2178_v8 = vld [vmem:[#allocation7 + $0x5a0] ss:$8 sps:$4 sm:$0xff]  }
  0x56   :  { %v2151_v53 = vld [vmem:[#allocation7 + $0xf0] ss:$8 sps:$4 sm:$0xff]   ;;  %v2156_v54 = vld [vmem:[#allocation7 + $0x5e4] ss:$8 sps:$4 sm:$0xff]   ;;  %v2181_v9 = vld [vmem:[#allocation7 + $0xa0] ss:$8 sps:$4 sm:$0xff]  }
  0x57   :  { %805 = vmatpush2.bf16.msra.mxu0 %v2056_v34  ;;  %v2130_v34 = vld [vmem:[#allocation7 + $0x520] ss:$8 sps:$4 sm:$0xff]   ;;  %v2180_v6 = vld [vmem:[#allocation7 + $0x5a4] ss:$8 sps:$4 sm:$0xff]  }
  0x58   :  { %848 = vmatpush2.bf16.msra.mxu1 %v2057_v35  ;;  %806 = vmatprep.subr.bf16.mxu0 %v2058_v36  ;;  %v2133_v35 = vld [vmem:[#allocation7 + $0x20] ss:$8 sps:$4 sm:$0xff]   ;;  %v2138_v36 = vld [vmem:[#allocation7 + $0x514] ss:$8 sps:$4 sm:$0xff]   ;;  %v2183_v7 = vld [vmem:[#allocation7 + $0xa4] ss:$8 sps:$4 sm:$0xff]  }
  0x59   :  { %849 = vmatprep.subr.bf16.mxu1 %v2060_v37  ;;  %v2141_v37 = vld [vmem:[#allocation7 + $0x14] ss:$8 sps:$4 sm:$0xff]  }
  0x5b   :  { %807 = vmatpush2.bf16.msra.mxu0 %v2062_v38  ;;  %v2136_v38 = vld [vmem:[#allocation7 + $0x510] ss:$8 sps:$4 sm:$0xff]  }
  0x5c   :  { %850 = vmatpush2.bf16.msra.mxu1 %v2063_v39  ;;  %808 = vmatprep.subr.bf16.mxu0 %v2064_v40  ;;  %v2139_v39 = vld [vmem:[#allocation7 + $0x10] ss:$8 sps:$4 sm:$0xff]   ;;  %v103_v40 = vld [vmem:[#allocation5 + $0x28] sm:$0xff] }
  0x5d   :  { %851 = vmatprep.subr.bf16.mxu1 %v2066_v41  ;;  %v109_v41 = vld [vmem:[#allocation5 + $0x58] sm:$0xff] }
  0x5f   :  { %809 = vmatpush2.bf16.msra.mxu0 %v2068_v42  ;;  %v81_v42 = vld [vmem:[#allocation2 + $0x8] sm:$0xff] }
  0x60   :  { %852 = vmatpush2.bf16.msra.mxu1 %v2069_v43  ;;  %810 = vmatprep.subr.bf16.mxu0 %v2070_v44  ;;  %v2144_v43 = vld [vmem:[#allocation7 + $0x504] ss:$8 sps:$4 sm:$0xff]   ;;  %v93_v47 = vpack.c.bf16 %v87_v46, %v81_v42  ;;  %v2222_v46 = vld [vmem:[#allocation7 + $0x134] ss:$8 sps:$4 sm:$0xff]  }
  0x61   :  { %853 = vmatprep.subr.bf16.mxu1 %v2072_v45  ;;  %v2147_v44 = vld [vmem:[#allocation7 + $0x4] ss:$8 sps:$4 sm:$0xff]   ;;  %v115_v45 = vpack.c.bf16 %v109_v41, %v103_v40  ;;  %v2211_v40 = vld [vmem:[#allocation7 + $0x250] ss:$8 sps:$4 sm:$0xff]  }
  0x62   :  { %v2216_v41 = vld [vmem:[#allocation7 + $0x144] ss:$8 sps:$4 sm:$0xff]  }
  0x63   :  { %811 = vmatpush2.bf16.msra.mxu0 %v2074_v50  ;;  %v2150_v50 = vld [vmem:[#allocation7 + $0x5f4] ss:$8 sps:$4 sm:$0xff]   ;;  %v2219_v42 = vld [vmem:[#allocation7 + $0x244] ss:$8 sps:$4 sm:$0xff]  }
  0x64   :  { %854 = vmatpush2.bf16.msra.mxu1 %v2075_v51  ;;  %812 = vmatprep.subr.bf16.mxu0 %v2076_v52  ;;  %v2153_v51 = vld [vmem:[#allocation7 + $0xf4] ss:$8 sps:$4 sm:$0xff]   ;;  %v2148_v52 = vld [vmem:[#allocation7 + $0x5f0] ss:$8 sps:$4 sm:$0xff]  }
  0x65   :  { %855 = vmatprep.subr.bf16.mxu1 %v2078_v55  ;;  %v2159_v55 = vld [vmem:[#allocation7 + $0xe4] ss:$8 sps:$4 sm:$0xff]  }
  0x67   :  { %813 = vmatpush2.bf16.msra.mxu0 %v2080_v56  ;;  %v2154_v56 = vld [vmem:[#allocation7 + $0x5e0] ss:$8 sps:$4 sm:$0xff]  }
  0x68   :  { %856 = vmatpush2.bf16.msra.mxu1 %v2081_v57  ;;  %814 = vmatprep.subr.bf16.mxu0 %v2082_v58  ;;  %v2157_v57 = vld [vmem:[#allocation7 + $0xe0] ss:$8 sps:$4 sm:$0xff]   ;;  %v2162_v58 = vld [vmem:[#allocation7 + $0x5d4] ss:$8 sps:$4 sm:$0xff]  }
  0x69   :  { %857 = vmatprep.subr.bf16.mxu1 %v2084_v59  ;;  %v2165_v59 = vld [vmem:[#allocation7 + $0xd4] ss:$8 sps:$4 sm:$0xff]  }
  0x6b   :  { %815 = vmatpush2.bf16.msra.mxu0 %v2086_v60  ;;  %v2160_v60 = vld [vmem:[#allocation7 + $0x5d0] ss:$8 sps:$4 sm:$0xff]  }
  0x6c   :  { %858 = vmatpush2.bf16.msra.mxu1 %v2087_v61  ;;  %816 = vmatprep.subr.bf16.mxu0 %v2088_v62  ;;  %v2163_v61 = vld [vmem:[#allocation7 + $0xd0] ss:$8 sps:$4 sm:$0xff]   ;;  %v2168_v62 = vld [vmem:[#allocation7 + $0x5c4] ss:$8 sps:$4 sm:$0xff]  }
  0x6d   :  { %859 = vmatprep.subr.bf16.mxu1 %v2090_v63  ;;  %v2171_v63 = vld [vmem:[#allocation7 + $0xc4] ss:$8 sps:$4 sm:$0xff]  }
  0x6f   :  { %817 = vmatpush2.bf16.msra.mxu0 %v2092_v0  ;;  %v2166_v0 = vld [vmem:[#allocation7 + $0x5c0] ss:$8 sps:$4 sm:$0xff]  }
  0x70   :  { %860 = vmatpush2.bf16.msra.mxu1 %v2093_v1  ;;  %818 = vmatprep.subr.bf16.mxu0 %v2094_v2  ;;  %v2169_v1 = vld [vmem:[#allocation7 + $0xc0] ss:$8 sps:$4 sm:$0xff]   ;;  %v2174_v2 = vld [vmem:[#allocation7 + $0x5b4] ss:$8 sps:$4 sm:$0xff]  }
  0x71   :  { %861 = vmatprep.subr.bf16.mxu1 %v2096_v3  ;;  %v2177_v3 = vld [vmem:[#allocation7 + $0xb4] ss:$8 sps:$4 sm:$0xff]  }
  0x73   :  { %819 = vmatpush2.bf16.msra.mxu0 %v2098_v4  ;;  %v2172_v4 = vld [vmem:[#allocation7 + $0x5b0] ss:$8 sps:$4 sm:$0xff]  }
  0x74   :  { %862 = vmatpush2.bf16.msra.mxu1 %v2099_v5  ;;  %874 = vmatprep.subr.bf16.mxu0 %v2102_v10  ;;  %v2175_v5 = vld [vmem:[#allocation7 + $0xb0] ss:$8 sps:$4 sm:$0xff]   ;;  %v2186_v10 = vld [vmem:[#allocation7 + $0x594] ss:$8 sps:$4 sm:$0xff]  }
  0x75   :  { %1397 = vmatprep.subr.bf16.mxu1 %v2105_v11  ;;  %v2189_v11 = vld [vmem:[#allocation7 + $0x94] ss:$8 sps:$4 sm:$0xff]  }
  0x76   :  { %821 = vmatmul.mubr.bf16.vlgmr.msra.gmra.mxu0 %v110_v12  ;;  %v2184_v12 = vld [vmem:[#allocation7 + $0x590] ss:$8 sps:$4 sm:$0xff]  }
  0x77   :  { %864 = vmatmul.mubr.bf16.vlgmr.msra.gmra.mxu1 %v112_v13  ;;  %875 = vmatpush1.bf16.msra.mxu0 %v2100_v14  ;;  %v2187_v13 = vld [vmem:[#allocation7 + $0x90] ss:$8 sps:$4 sm:$0xff]   ;;  %v2192_v14 = vld [vmem:[#allocation7 + $0x584] ss:$8 sps:$4 sm:$0xff]  }
  0x78   :  { %1398 = vmatpush1.bf16.msra.mxu1 %v2103_v15  ;;  %876 = vmatprep.subr.bf16.mxu0 %v2108_v16  ;;  %v2195_v15 = vld [vmem:[#allocation7 + $0x84] ss:$8 sps:$4 sm:$0xff]   ;;  %v2190_v16 = vld [vmem:[#allocation7 + $0x580] ss:$8 sps:$4 sm:$0xff]  }
  0x79   :  { %1399 = vmatprep.subr.bf16.mxu1 %v2111_v17  ;;  %906 = vmatprep.mubr.bf16.mxu0 %v115_v45  ;;  %v2193_v17 = vld [vmem:[#allocation7 + $0x80] ss:$8 sps:$4 sm:$0xff]  }
  0x7a   :  { %1429 = vmatprep.mubr.bf16.mxu1 %v93_v47  ;;  %v2217_v45 = vld [vmem:[#allocation7 + $0x240] ss:$8 sps:$4 sm:$0xff]   ;;  %v2225_v47 = vld [vmem:[#allocation7 + $0x234] ss:$8 sps:$4 sm:$0xff]  }
  0x7b   :  { %877 = vmatpush1.bf16.msra.mxu0 %v2106_v18  ;;  %v102_v18 = vld [vmem:[#allocation5 + $0x20] sm:$0xff] }
  0x7c   :  { %1400 = vmatpush1.bf16.msra.mxu1 %v2109_v19  ;;  %878 = vmatprep.subr.bf16.mxu0 %v2114_v20  ;;  %v108_v19 = vld [vmem:[#allocation5 + $0x50] sm:$0xff]  ;;  %v80_v20 = vld [vmem:[#allocation2] sm:$0xff] }
  0x7d   :  { %1401 = vmatprep.subr.bf16.mxu1 %v2117_v21  ;;  %v86_v21 = vld [vmem:[#allocation2 + $0x30] sm:$0xff] }
  0x7f   :  { %879 = vmatpush1.bf16.msra.mxu0 %v2112_v22  ;;  %v2198_v22 = vld [vmem:[#allocation7 + $0x174] ss:$8 sps:$4 sm:$0xff]  }
  0x80   :  { %1402 = vmatpush1.bf16.msra.mxu1 %v2115_v23  ;;  %880 = vmatprep.subr.bf16.mxu0 %v2120_v24  ;;  %v2201_v23 = vld [vmem:[#allocation7 + $0x274] ss:$8 sps:$4 sm:$0xff]   ;;  %v114_v24 = vpack.c.bf16 %v108_v19, %v102_v18  ;;  %v2276_v18 = vld [vmem:[#allocation7 + $0x1a4] ss:$8 sps:$4 sm:$0xff]  }
  0x81   :  { %1403 = vmatprep.subr.bf16.mxu1 %v2123_v25  ;;  %v92_v25 = vpack.c.bf16 %v86_v21, %v80_v20  ;;  %v2279_v19 = vld [vmem:[#allocation7 + $0x2a4] ss:$8 sps:$4 sm:$0xff]   ;;  %v2274_v20 = vld [vmem:[#allocation7 + $0x1a0] ss:$8 sps:$4 sm:$0xff]  }
  0x82   :  { %v2277_v21 = vld [vmem:[#allocation7 + $0x2a0] ss:$8 sps:$4 sm:$0xff]  }
  0x83   :  { %881 = vmatpush1.bf16.msra.mxu0 %v2118_v26  ;;  %v2196_v26 = vld [vmem:[#allocation7 + $0x170] ss:$8 sps:$4 sm:$0xff]  }
  0x84   :  { %1404 = vmatpush1.bf16.msra.mxu1 %v2121_v27  ;;  %882 = vmatprep.subr.bf16.mxu0 %v2126_v28  ;;  %v2199_v27 = vld [vmem:[#allocation7 + $0x270] ss:$8 sps:$4 sm:$0xff]   ;;  %v2204_v28 = vld [vmem:[#allocation7 + $0x164] ss:$8 sps:$4 sm:$0xff]  }
  0x85   :  { %1405 = vmatprep.subr.bf16.mxu1 %v2129_v29  ;;  %v2207_v29 = vld [vmem:[#allocation7 + $0x264] ss:$8 sps:$4 sm:$0xff]  }
  0x87   :  { %883 = vmatpush1.bf16.msra.mxu0 %v2124_v30  ;;  %v2202_v30 = vld [vmem:[#allocation7 + $0x160] ss:$8 sps:$4 sm:$0xff]  }
  0x88   :  { %1406 = vmatpush1.bf16.msra.mxu1 %v2127_v31  ;;  %884 = vmatprep.subr.bf16.mxu0 %v2132_v32  ;;  %v2205_v31 = vld [vmem:[#allocation7 + $0x260] ss:$8 sps:$4 sm:$0xff]   ;;  %v2210_v32 = vld [vmem:[#allocation7 + $0x154] ss:$8 sps:$4 sm:$0xff]  }
  0x89   :  { %1407 = vmatprep.subr.bf16.mxu1 %v2135_v33  ;;  %v2213_v33 = vld [vmem:[#allocation7 + $0x254] ss:$8 sps:$4 sm:$0xff]  }
  0x8b   :  { %885 = vmatpush1.bf16.msra.mxu0 %v2130_v34  ;;  %v83_v34 = vld [vmem:[#allocation2 + $0x18] sm:$0xff] }
  0x8c   :  { %1408 = vmatpush1.bf16.msra.mxu1 %v2133_v35  ;;  %886 = vmatprep.subr.bf16.mxu0 %v2138_v36  ;;  %v89_v35 = vld [vmem:[#allocation2 + $0x48] sm:$0xff]  ;;  %v2208_v36 = vld [vmem:[#allocation7 + $0x150] ss:$8 sps:$4 sm:$0xff]  }
  0x8d   :  { %1409 = vmatprep.subr.bf16.mxu1 %v2141_v37  ;;  %v95_v37 = vpack.c.bf16 %v89_v35, %v83_v34 }
  0x8f   :  { %887 = vmatpush1.bf16.msra.mxu0 %v2136_v38  ;;  %v85_v38 = vld [vmem:[#allocation2 + $0x28] sm:$0xff] }
  0x90   :  { %1410 = vmatpush1.bf16.msra.mxu1 %v2139_v39  ;;  %888 = vmatprep.subr.bf16.mxu0 %v2144_v43  ;;  %v91_v39 = vld [vmem:[#allocation2 + $0x58] sm:$0xff] }
  0x91   :  { %1411 = vmatprep.subr.bf16.mxu1 %v2147_v44  ;;  %v97_v43 = vpack.c.bf16 %v91_v39, %v85_v38  ;;  %v2214_v44 = vld [vmem:[#allocation7 + $0x140] ss:$8 sps:$4 sm:$0xff]   ;;  %v2294_v38 = vld [vmem:[#allocation8 + $0x70] sm:$0xff]  }
  0x92   :  { %v2295_v39 = vld [vmem:[#allocation8 + $0x30] sm:$0xff]  }
  0x93   :  { %889 = vmatpush1.bf16.msra.mxu0 %v2142_v48  ;;  %v2220_v48 = vld [vmem:[#allocation7 + $0x130] ss:$8 sps:$4 sm:$0xff]  }
  0x94   :  { %1412 = vmatpush1.bf16.msra.mxu1 %v2145_v49  ;;  %890 = vmatprep.subr.bf16.mxu0 %v2150_v50  ;;  %v2223_v49 = vld [vmem:[#allocation7 + $0x230] ss:$8 sps:$4 sm:$0xff]   ;;  %v2228_v50 = vld [vmem:[#allocation7 + $0x124] ss:$8 sps:$4 sm:$0xff]  }
  0x95   :  { %1413 = vmatprep.subr.bf16.mxu1 %v2153_v51  ;;  %v2231_v51 = vld [vmem:[#allocation7 + $0x224] ss:$8 sps:$4 sm:$0xff]  }
  0x97   :  { %891 = vmatpush2.bf16.msra.mxu0 %v2148_v52  ;;  %v2226_v52 = vld [vmem:[#allocation7 + $0x120] ss:$8 sps:$4 sm:$0xff]  }
  0x98   :  { %1414 = vmatpush2.bf16.msra.mxu1 %v2151_v53  ;;  %892 = vmatprep.subr.bf16.mxu0 %v2156_v54  ;;  %v2229_v53 = vld [vmem:[#allocation7 + $0x220] ss:$8 sps:$4 sm:$0xff]   ;;  %v2234_v54 = vld [vmem:[#allocation7 + $0x114] ss:$8 sps:$4 sm:$0xff]  }
  0x99   :  { %1415 = vmatprep.subr.bf16.mxu1 %v2159_v55  ;;  %v2237_v55 = vld [vmem:[#allocation7 + $0x214] ss:$8 sps:$4 sm:$0xff]  }
  0x9b   :  { %893 = vmatpush2.bf16.msra.mxu0 %v2154_v56  ;;  %v2232_v56 = vld [vmem:[#allocation7 + $0x110] ss:$8 sps:$4 sm:$0xff]  }
  0x9c   :  { %1416 = vmatpush2.bf16.msra.mxu1 %v2157_v57  ;;  %894 = vmatprep.subr.bf16.mxu0 %v2162_v58  ;;  %v2235_v57 = vld [vmem:[#allocation7 + $0x210] ss:$8 sps:$4 sm:$0xff]   ;;  %v2240_v58 = vld [vmem:[#allocation7 + $0x104] ss:$8 sps:$4 sm:$0xff]  }
  0x9d   :  { %1417 = vmatprep.subr.bf16.mxu1 %v2165_v59  ;;  %v2243_v59 = vld [vmem:[#allocation7 + $0x204] ss:$8 sps:$4 sm:$0xff]  }
  0x9f   :  { %895 = vmatpush2.bf16.msra.mxu0 %v2160_v60  ;;  %v2238_v60 = vld [vmem:[#allocation7 + $0x100] ss:$8 sps:$4 sm:$0xff]  }
  0xa0   :  { %1418 = vmatpush2.bf16.msra.mxu1 %v2163_v61  ;;  %896 = vmatprep.subr.bf16.mxu0 %v2168_v62  ;;  %v2241_v61 = vld [vmem:[#allocation7 + $0x200] ss:$8 sps:$4 sm:$0xff]   ;;  %v2246_v62 = vld [vmem:[#allocation7 + $0x1f4] ss:$8 sps:$4 sm:$0xff]  }
  0xa1   :  { %1419 = vmatprep.subr.bf16.mxu1 %v2171_v63  ;;  %v2249_v63 = vld [vmem:[#allocation7 + $0x2f4] ss:$8 sps:$4 sm:$0xff]  }
  0xa3   :  { %897 = vmatpush2.bf16.msra.mxu0 %v2166_v0  ;;  %v2244_v0 = vld [vmem:[#allocation7 + $0x1f0] ss:$8 sps:$4 sm:$0xff]  }
  0xa4   :  { %1420 = vmatpush2.bf16.msra.mxu1 %v2169_v1  ;;  %898 = vmatprep.subr.bf16.mxu0 %v2174_v2  ;;  %v2247_v1 = vld [vmem:[#allocation7 + $0x2f0] ss:$8 sps:$4 sm:$0xff]   ;;  %v2252_v2 = vld [vmem:[#allocation7 + $0x1e4] ss:$8 sps:$4 sm:$0xff]  }
  0xa5   :  { %1421 = vmatprep.subr.bf16.mxu1 %v2177_v3  ;;  %v2255_v3 = vld [vmem:[#allocation7 + $0x2e4] ss:$8 sps:$4 sm:$0xff]  }
  0xa7   :  { %899 = vmatpush2.bf16.msra.mxu0 %v2172_v4  ;;  %v2250_v4 = vld [vmem:[#allocation7 + $0x1e0] ss:$8 sps:$4 sm:$0xff]  }
  0xa8   :  { %1422 = vmatpush2.bf16.msra.mxu1 %v2175_v5  ;;  %900 = vmatprep.subr.bf16.mxu0 %v2180_v6  ;;  %v2253_v5 = vld [vmem:[#allocation7 + $0x2e0] ss:$8 sps:$4 sm:$0xff]   ;;  %v2258_v6 = vld [vmem:[#allocation7 + $0x1d4] ss:$8 sps:$4 sm:$0xff]  }
  0xa9   :  { %1423 = vmatprep.subr.bf16.mxu1 %v2183_v7  ;;  %v2261_v7 = vld [vmem:[#allocation7 + $0x2d4] ss:$8 sps:$4 sm:$0xff]  }
  0xab   :  { %901 = vmatpush2.bf16.msra.mxu0 %v2178_v8  ;;  %v2256_v8 = vld [vmem:[#allocation7 + $0x1d0] ss:$8 sps:$4 sm:$0xff]  }
  0xac   :  { %1424 = vmatpush2.bf16.msra.mxu1 %v2181_v9  ;;  %902 = vmatprep.subr.bf16.mxu0 %v2186_v10  ;;  %v2259_v9 = vld [vmem:[#allocation7 + $0x2d0] ss:$8 sps:$4 sm:$0xff]   ;;  %v2264_v10 = vld [vmem:[#allocation7 + $0x1c4] ss:$8 sps:$4 sm:$0xff]  }
  0xad   :  { %1425 = vmatprep.subr.bf16.mxu1 %v2189_v11  ;;  %v2267_v11 = vld [vmem:[#allocation7 + $0x2c4] ss:$8 sps:$4 sm:$0xff]  }
  0xaf   :  { %903 = vmatpush2.bf16.msra.mxu0 %v2184_v12  ;;  %v2262_v12 = vld [vmem:[#allocation7 + $0x1c0] ss:$8 sps:$4 sm:$0xff]  }
  0xb0   :  { %1426 = vmatpush2.bf16.msra.mxu1 %v2187_v13  ;;  %904 = vmatprep.subr.bf16.mxu0 %v2192_v14  ;;  %v2265_v13 = vld [vmem:[#allocation7 + $0x2c0] ss:$8 sps:$4 sm:$0xff]   ;;  %v2270_v14 = vld [vmem:[#allocation7 + $0x1b4] ss:$8 sps:$4 sm:$0xff]  }
  0xb1   :  { %1427 = vmatprep.subr.bf16.mxu1 %v2195_v15  ;;  %v2273_v15 = vld [vmem:[#allocation7 + $0x2b4] ss:$8 sps:$4 sm:$0xff]  }
  0xb3   :  { %905 = vmatpush2.bf16.msra.mxu0 %v2190_v16  ;;  %v2268_v16 = vld [vmem:[#allocation7 + $0x1b0] ss:$8 sps:$4 sm:$0xff]  }
  0xb4   :  { %1428 = vmatpush2.bf16.msra.mxu1 %v2193_v17  ;;  %1440 = vmatprep.subr.bf16.mxu0 %v2198_v22  ;;  %v2271_v17 = vld [vmem:[#allocation7 + $0x2b0] ss:$8 sps:$4 sm:$0xff]   ;;  %v2282_v22 = vld [vmem:[#allocation7 + $0x194] ss:$8 sps:$4 sm:$0xff]  }
  0xb5   :  { %1483 = vmatprep.subr.bf16.mxu1 %v2201_v23  ;;  %v2285_v23 = vld [vmem:[#allocation7 + $0x294] ss:$8 sps:$4 sm:$0xff]  }
  0xb6   :  { %907 = vmatmul.mubr.bf16.vlgmr.msra.gmra.mxu0 %v114_v24  ;;  %v2280_v24 = vld [vmem:[#allocation7 + $0x190] ss:$8 sps:$4 sm:$0xff]  }
  0xb7   :  { %1430 = vmatmul.mubr.bf16.vlgmr.msra.gmra.mxu1 %v92_v25  ;;  %1441 = vmatpush1.bf16.msra.mxu0 %v2196_v26  ;;  %v2283_v25 = vld [vmem:[#allocation7 + $0x290] ss:$8 sps:$4 sm:$0xff]   ;;  %v2288_v26 = vld [vmem:[#allocation7 + $0x184] ss:$8 sps:$4 sm:$0xff]  }
  0xb8   :  { %1484 = vmatpush1.bf16.msra.mxu1 %v2199_v27  ;;  %1442 = vmatprep.subr.bf16.mxu0 %v2204_v28  ;;  %v2291_v27 = vld [vmem:[#allocation7 + $0x284] ss:$8 sps:$4 sm:$0xff]   ;;  %v2286_v28 = vld [vmem:[#allocation7 + $0x180] ss:$8 sps:$4 sm:$0xff]  }
  0xb9   :  { %1485 = vmatprep.subr.bf16.mxu1 %v2207_v29  ;;  %1472 = vmatprep.mubr.bf16.mxu0 %v95_v37  ;;  %v2289_v29 = vld [vmem:[#allocation7 + $0x280] ss:$8 sps:$4 sm:$0xff]   ;;  %v2293_v37 = vld [vmem:[#allocation8 + $0x38] sm:$0xff]  }
  0xba   :  { %1515 = vmatprep.mubr.bf16.mxu1 %v97_v43  ;;  %v2299_v43 = vld [vmem:[#allocation8 + $0x20] sm:$0xff]  }
  0xbb   :  { %1443 = vmatpush1.bf16.msra.mxu0 %v2202_v30  ;;  %v82_v30 = vld [vmem:[#allocation2 + $0x10] sm:$0xff] }
  0xbc   :  { %1486 = vmatpush1.bf16.msra.mxu1 %v2205_v31  ;;  %1444 = vmatprep.subr.bf16.mxu0 %v2210_v32  ;;  %v88_v31 = vld [vmem:[#allocation2 + $0x40] sm:$0xff] }
  0xbd   :  { %1487 = vmatprep.subr.bf16.mxu1 %v2213_v33  ;;  %v84_v32 = vld [vmem:[#allocation2 + $0x20] sm:$0xff]  ;;  %v90_v33 = vld [vmem:[#allocation2 + $0x50] sm:$0xff]  ;;  %v94_v34 = vpack.c.bf16 %v88_v31, %v82_v30 }
  0xbe   :  { %v96_v35 = vpack.c.bf16 %v90_v33, %v84_v32 }
  0xbf   :  { %1445 = vmatpush1.bf16.msra.mxu0 %v2208_v36  ;;  %v2292_v36 = vld [vmem:[#allocation8 + $0x78] sm:$0xff]  }
  0xc0   :  { %1488 = vmatpush1.bf16.msra.mxu1 %v2211_v40  ;;  %1446 = vmatprep.subr.bf16.mxu0 %v2216_v41  ;;  %v2296_v40 = vld [vmem:[#allocation8 + $0x68] sm:$0xff]  }
  0xc1   :  { %1489 = vmatprep.subr.bf16.mxu1 %v2219_v42  ;;  %v2297_v41 = vld [vmem:[#allocation8 + $0x28] sm:$0xff]   ;;  %v2298_v42 = vld [vmem:[#allocation8 + $0x60] sm:$0xff]  }
  0xc3   :  { %1447 = vmatpush1.bf16.msra.mxu0 %v2214_v44  ;;  %v2300_v44 = vld [vmem:[#allocation8 + $0x58] sm:$0xff]  }
  0xc4   :  { %1490 = vmatpush1.bf16.msra.mxu1 %v2217_v45  ;;  %1448 = vmatprep.subr.bf16.mxu0 %v2222_v46  ;;  %v2301_v45 = vld [vmem:[#allocation8 + $0x18] sm:$0xff]   ;;  %v2302_v46 = vld [vmem:[#allocation8 + $0x50] sm:$0xff]  }
  0xc5   :  { %1491 = vmatprep.subr.bf16.mxu1 %v2225_v47  ;;  %v2303_v47 = vld [vmem:[#allocation8 + $0x10] sm:$0xff]  }
  0xc7   :  { %1449 = vmatpush1.bf16.msra.mxu0 %v2220_v48  ;;  %v2304_v48 = vld [vmem:[#allocation8 + $0x48] sm:$0xff]  }
  0xc8   :  { %1492 = vmatpush1.bf16.msra.mxu1 %v2223_v49  ;;  %1450 = vmatprep.subr.bf16.mxu0 %v2228_v50  ;;  %v2305_v49 = vld [vmem:[#allocation8 + $0x8] sm:$0xff]   ;;  %v2306_v50 = vld [vmem:[#allocation8 + $0x40] sm:$0xff]  }
  0xc9   :  { %1493 = vmatprep.subr.bf16.mxu1 %v2231_v51  ;;  %v2307_v51 = vld [vmem:[#allocation8] sm:$0xff]  }
  0xcb   :  { %1451 = vmatpush1.bf16.msra.mxu0 %v2226_v52 }
  0xcc   :  { %1494 = vmatpush1.bf16.msra.mxu1 %v2229_v53  ;;  %1452 = vmatprep.subr.bf16.mxu0 %v2234_v54 }
  0xcd   :  { %1495 = vmatprep.subr.bf16.mxu1 %v2237_v55 }
  0xcf   :  { %1453 = vmatpush1.bf16.msra.mxu0 %v2232_v56 }
  0xd0   :  { %1496 = vmatpush1.bf16.msra.mxu1 %v2235_v57  ;;  %1454 = vmatprep.subr.bf16.mxu0 %v2240_v58 }
  0xd1   :  { %1497 = vmatprep.subr.bf16.mxu1 %v2243_v59 }
  0xd3   :  { %1455 = vmatpush1.bf16.msra.mxu0 %v2238_v60 }
  0xd4   :  { %1498 = vmatpush1.bf16.msra.mxu1 %v2241_v61  ;;  %1456 = vmatprep.subr.bf16.mxu0 %v2246_v62 }
  0xd5   :  { %1499 = vmatprep.subr.bf16.mxu1 %v2249_v63 }
  0xd7   :  { %1457 = vmatpush2.bf16.msra.mxu0 %v2244_v0 }
  0xd8   :  { %1500 = vmatpush2.bf16.msra.mxu1 %v2247_v1  ;;  %1458 = vmatprep.subr.bf16.mxu0 %v2252_v2 }
  0xd9   :  { %1501 = vmatprep.subr.bf16.mxu1 %v2255_v3  ;;  %v1528_v3 = vlaneseq }
  0xdb   :  { %1459 = vmatpush2.bf16.msra.mxu0 %v2250_v4 }
  0xdc   :  { %1502 = vmatpush2.bf16.msra.mxu1 %v2253_v5  ;;  %1460 = vmatprep.subr.bf16.mxu0 %v2258_v6 }
  0xdd   :  { %1503 = vmatprep.subr.bf16.mxu1 %v2261_v7 }
  0xdf   :  { %1461 = vmatpush2.bf16.msra.mxu0 %v2256_v8 }
  0xe0   :  { %1504 = vmatpush2.bf16.msra.mxu1 %v2259_v9  ;;  %1462 = vmatprep.subr.bf16.mxu0 %v2264_v10  ;;  %v1529_v10 = vshrl.u32 %v1528_v3, 7 }
  0xe1   :  { %1505 = vmatprep.subr.bf16.mxu1 %v2267_v11 }
  0xe3   :  { %1463 = vmatpush2.bf16.msra.mxu0 %v2262_v12 }
  0xe4   :  { %1506 = vmatpush2.bf16.msra.mxu1 %v2265_v13  ;;  %1464 = vmatprep.subr.bf16.mxu0 %v2270_v14 }
  0xe5   :  { %1507 = vmatprep.subr.bf16.mxu1 %v2273_v15 }
  0xe7   :  { %1465 = vmatpush2.bf16.msra.mxu0 %v2268_v16 }
  0xe8   :  { %1508 = vmatpush2.bf16.msra.mxu1 %v2271_v17  ;;  %1466 = vmatprep.subr.bf16.mxu0 %v2276_v18  ;;  %v1534_v18 = vsub.s32 1, %v1529_v10 }
  0xe9   :  { %1509 = vmatprep.subr.bf16.mxu1 %v2279_v19 }
  0xeb   :  { %1467 = vmatpush2.bf16.msra.mxu0 %v2274_v20  ;;  %v1530_v20 = vsub.s32 0, %v1529_v10 }
  0xec   :  { %1510 = vmatpush2.bf16.msra.mxu1 %v2277_v21  ;;  %1468 = vmatprep.subr.bf16.mxu0 %v2282_v22 }
  0xed   :  { %1511 = vmatprep.subr.bf16.mxu1 %v2285_v23 }
  0xef   :  { %1469 = vmatpush2.bf16.msra.mxu0 %v2280_v24  ;;  %v1526_v24 = vld [vmem:[%s2492_s3] sm:$0x3] }
  0xf0   :  { %1512 = vmatpush2.bf16.msra.mxu1 %v2283_v25  ;;  %1470 = vmatprep.subr.bf16.mxu0 %v2288_v26  ;;  %v1535_v30 = vrot.slane %v1526_v24, %v1534_v18  ;;  %v1531_v33 = vrot.slane %v1526_v24, %v1530_v20 }
  0xf1   :  { %1513 = vmatprep.subr.bf16.mxu1 %v2291_v27 }
  0xf3   :  { %1471 = vmatpush2.bf16.msra.mxu0 %v2286_v28 }
  0xf4   :  { %1514 = vmatpush2.bf16.msra.mxu1 %v2289_v29  ;;  %1971 = vmatprep.subr.bf16.mxu0 %v2292_v36 }
  0xf6   :  { %1473 = vmatmul.mubr.bf16.vlgmr.msra.gmra.mxu0 %v94_v34 }
  0xf7   :  { %1516 = vmatmul.mubr.bf16.vlgmr.msra.gmra.mxu1 %v96_v35  ;;  %1972 = vmatpush3.bf16.msra.mxu0 %v2293_v37 }
  0xf8   :  { %1973 = vmatprep.subr.bf16.mxu0 %v2294_v38 }
  0xfb   :  { %1974 = vmatpush3.bf16.msra.mxu0 %v2295_v39 }
  0xfc   :  { %1975 = vmatprep.subr.bf16.mxu0 %v2296_v40 }
  0xff   :  { %1976 = vmatpush3.bf16.msra.mxu0 %v2297_v41 }
 0x100   :  { %1977 = vmatprep.subr.bf16.mxu0 %v2298_v42 }
 0x103   :  { %1978 = vmatpush3.bf16.msra.mxu0 %v2299_v43 }
 0x104   :  { %1979 = vmatprep.subr.bf16.mxu0 %v2300_v44 }
 0x107   :  { %1980 = vmatpush3.bf16.msra.mxu0 %v2301_v45 }
 0x108   :  { %1981 = vmatprep.subr.bf16.mxu0 %v2302_v46 }
 0x10b   :  { %1982 = vmatpush3.bf16.msra.mxu0 %v2303_v47 }
 0x10c   :  { %1983 = vmatprep.subr.bf16.mxu0 %v2304_v48 }
 0x10f   :  { %1984 = vmatpush3.bf16.msra.mxu0 %v2305_v49 }
 0x110   :  { %1985 = vmatprep.subr.bf16.mxu0 %v2306_v50 }
 0x113   :  { %1986 = vmatpush3.bf16.msra.mxu0 %v2307_v51 }
 0x136   :  { %v822_v52 = vpop.f32.mrf.mxu0 }
 0x137   :  { %v865_v53 = vpop.f32.mrf.mxu1 }
 0x138   :  { %v824_v54 = vpop.f32.mrf.mxu0  ;;  %v866_v0 = vadd.f32 %v865_v53, %v822_v52  ;;  %v1945_v53 = vld [vmem:[%s2494_s5] ss:$0 sm:$0xff] }
 0x139   :  { %v867_v55 = vpop.f32.mrf.mxu1 }
 0x13a   :  { %v826_v56 = vpop.f32.mrf.mxu0  ;;  %v868_v4 = vadd.f32 %v867_v55, %v824_v54 }
 0x13b   :  { %v869_v57 = vpop.f32.mrf.mxu1 }
 0x13c   :  { %v828_v58 = vpop.f32.mrf.mxu0  ;;  %v870_v6 = vadd.f32 %v869_v57, %v826_v56 }
 0x13d   :  { %v871_v59 = vpop.f32.mrf.mxu1 }
 0x13e   :  { %v872_v11 = vadd.f32 %v871_v59, %v828_v58 }
 0x176   :  { %v908_v60 = vpop.f32.mrf.mxu0 }
 0x177   :  { %v1431_v61 = vpop.f32.mrf.mxu1  ;;  %v909_v5 = vadd.f32 %v908_v60, %v866_v0 }
 0x178   :  { %v910_v62 = vpop.f32.mrf.mxu0 }
 0x179   :  { %v1433_v63 = vpop.f32.mrf.mxu1  ;;  %v911_v7 = vadd.f32 %v910_v62, %v868_v4  ;;  %v1432_v13 = vadd.f32 %v1431_v61, %v909_v5 }
 0x17a   :  { %v912_v1 = vpop.f32.mrf.mxu0 }
 0x17b   :  { %v1435_v2 = vpop.f32.mrf.mxu1  ;;  %v913_v12 = vadd.f32 %v912_v1, %v870_v6  ;;  %v1434_v16 = vadd.f32 %v1433_v63, %v911_v7 }
 0x17c   :  { %v914_v8 = vpop.f32.mrf.mxu0 }
 0x17d   :  { %v1437_v9 = vpop.f32.mrf.mxu1  ;;  %v915_v17 = vadd.f32 %v914_v8, %v872_v11  ;;  %v1436_v23 = vadd.f32 %v1435_v2, %v913_v12 }
 0x17f   :  { %v1438_v28 = vadd.f32 %v1437_v9, %v915_v17 }
 0x1b6   :  { %v1474_v14 = vpop.f32.mrf.mxu0 }
 0x1b7   :  { %v1517_v15 = vpop.f32.mrf.mxu1  ;;  %v1475_v19 = vadd.f32 %v1474_v14, %v1432_v13 }
 0x1b8   :  { %v1476_v21 = vpop.f32.mrf.mxu0 }
 0x1b9   :  { %v1519_v22 = vpop.f32.mrf.mxu1  ;;  %v1477_v25 = vadd.f32 %v1476_v21, %v1434_v16  ;;  %v1518_v32 = vadd.f32 %v1517_v15, %v1475_v19 }
 0x1ba   :  { %v1478_v26 = vpop.f32.mrf.mxu0 }
 0x1bb   :  { %v1521_v27 = vpop.f32.mrf.mxu1  ;;  %v1520_v29 = vadd.f32 %v1519_v22, %v1477_v25  ;;  %v1479_v31 = vadd.f32 %v1478_v26, %v1436_v23  ;;  %v1538_v41 = vadd.f32 %v1531_v33, %v1518_v32 }
 0x1bc   :  { %v1480_v34 = vpop.f32.mrf.mxu0 }
 0x1bd   :  { %v1522_v35 = vadd.f32 %v1521_v27, %v1479_v31  ;;  %v1481_v36 = vadd.f32 %v1480_v34, %v1438_v28  ;;  %v1523_v37 = vpop.f32.mrf.mxu1  ;;  %v1539_v38 = vadd.f32 %v1535_v30, %v1520_v29  ;;  %v1542_v46 = vmax.f32 %v1538_v41, 0.0 }
 0x1bf   :  { %v1540_v39 = vadd.f32 %v1531_v33, %v1522_v35  ;;  %v1524_v40 = vadd.f32 %v1523_v37, %v1481_v36  ;;  %v1543_v44 = vmax.f32 %v1539_v38, 0.0 }
 0x1c1   :  { %v1541_v42 = vadd.f32 %v1535_v30, %v1524_v40  ;;  %v1544_v43 = vmax.f32 %v1540_v39, 0.0 }
 0x1c3   :  { %v1545_v45 = vmax.f32 %v1541_v42, 0.0  ;;  %v1546_v48 = vpack.c.bf16 %v1544_v43, %v1542_v46 }
 0x1c5   :  { %v1547_v47 = vpack.c.bf16 %v1545_v45, %v1543_v44 }
 0x1c7   :  { %1715 = vmatprep.mubr.bf16.mxu0 %v1547_v47 }
 0x1c8   :  { %1716 = vmatmul.mubr.bf16.vlgmr.msra.gmra.mxu0 %v1546_v48 }
 0x288   :  { %v1987_v49 = vpop.f32.mrf.mxu0 }
 0x28a   :  { %v1988_v50 = vpop.f32.mrf.mxu0 }
 0x28b   :  { %v1989_v52 = vadd.f32 %v1988_v50, %v1987_v49 }
 0x28c   :  { %v1990_v51 = vpop.f32.mrf.mxu0 }
 0x28d   :  { %v1718_v56 = vadd.f32 %v1989_v52, %v1945_v53 }
 0x28e   :  { %v1991_v54 = vpop.f32.mrf.mxu0 }
 0x28f   :  { %v1992_v55 = vadd.f32 %v1991_v54, %v1990_v51 }
 0x291   :  { %v1721_v57 = vadd.f32 %v1992_v55, %v1945_v53 }
 0x293   :  { %v1969_v58 = vpack.c.bf16 %v1721_v57, %v1718_v56 }
 0x295   :  { %1970 = vst [vmem:[#allocation10] sm:$0xff] %v1969_v58  }
 0x296   :  { %2399 = shalt.err (!%p2396_p10)
}
 0x297   :  { %1745 = dma.vmem_to_hbm [thread:$0]  %s1740_s23, 128, %s2495_s6, [#allocation4], %s2424_s17, %s2424_s17, %s2425_s18  }
 0x298   :  { %2414 = dma.done.wait [#allocation4], 128  }
 0x299   :  { %2415 = vsyncadd [#allocation4], 4294967168 }
 0x29a   :  { %1749 = vsyncpa [#allocation3], 1 }
 0x29b   :  { %1750 = vsyncpa [#allocation6], 1 }
 0x29c   :  { %1751 = vsyncpa [#allocation9], 1 }
 0x29d   :  { %1752 = vsyncpa [#allocation4], 1 }

</bundles_post_ra>
